<compile_context>
chip_gen: v6e
topology: v6e:2x2x1
jax: 0.10.0
libtpu: 0.0.40
codegen_flags: <defaults>
</compile_context>

<pallas_src>
import functools

import jax
import jax.numpy as jnp
from jax.experimental import pallas as pl
from jax.experimental.pallas import tpu as pltpu


def _align(n, m):
    return ((n + m - 1) // m) * m


def _bottleneck_kernel(x_ref, w_ref, b_ref, mask_ref, pool_ref, bcast_ref,
                       o_ref, *, n_img, w_img, cin, p8, c4, cr8, w_off, b_off):
    f32 = jnp.float32
    bf16 = jnp.bfloat16

    x = x_ref[...]                                               # (Cin, NHW) f32

    # --- conv1 (1x1, BN1 folded) + bias + relu -------------------------------
    w1 = w_ref[w_off[0]:w_off[0] + p8, :cin]                     # (P8, Cin) bf16
    h1 = jnp.dot(w1, x.astype(bf16), preferred_element_type=f32)
    h1 = jnp.maximum(h1 + b_ref[b_off[0]:b_off[0] + p8, :], 0.0)  # (P8, NHW)

    # --- conv2 (3x3, pad=1, stride=1) as ONE im2col matmul -------------------
    # Nine lane-shifted copies of h1 (each exactly one (8,128) f32 vreg),
    # border-masked with a precomputed 0/1 stack, against the BN2-folded
    # (P8, 9*P8) weight.
    def shifted(a, s):
        if s == 0:
            return a
        z = jnp.zeros((a.shape[0], abs(s)), a.dtype)
        if s > 0:
            return jnp.concatenate([a[:, s:], z], axis=1)
        return jnp.concatenate([z, a[:, :s]], axis=1)

    pieces = [shifted(h1, ky * w_img + kx)
              for ky in (-1, 0, 1) for kx in (-1, 0, 1)]
    patches = jnp.concatenate(pieces, axis=0) * mask_ref[...]    # (9*P8, NHW)
    w2 = w_ref[w_off[1]:w_off[1] + p8, :9 * p8]                  # (P8, 9*P8) bf16
    h2 = jnp.dot(w2, patches.astype(bf16), preferred_element_type=f32)
    h2 = jnp.maximum(h2 + b_ref[b_off[1]:b_off[1] + p8, :], 0.0)

    # --- conv3 (1x1, BN3 folded) ---------------------------------------------
    w3 = w_ref[w_off[2]:w_off[2] + c4, :p8]                      # (C4, P8) bf16
    h3 = jnp.dot(w3, h2.astype(bf16), preferred_element_type=f32)
    h3 = h3 + b_ref[b_off[2]:b_off[2] + c4, :]                   # (C4, NHW) f32

    # --- SE: per-image GAP (matmul vs 0/1 pool matrix; 1/(H*W) folded in fc1),
    #     fc1 + relu, fc2, sigmoid ---------------------------------------------
    v = jnp.dot(h3.astype(bf16), pool_ref[...],
                preferred_element_type=f32)                      # (C4, N)
    wf1 = w_ref[w_off[3]:w_off[3] + cr8, :c4]
    f1 = jnp.dot(wf1, v.astype(bf16), preferred_element_type=f32)
    f1 = jnp.maximum(f1 + b_ref[b_off[3]:b_off[3] + cr8, :], 0.0)  # (Cr8, N)
    wf2 = w_ref[w_off[4]:w_off[4] + c4, :cr8]
    f2 = jnp.dot(wf2, f1.astype(bf16), preferred_element_type=f32)
    f2 = f2 + b_ref[b_off[4]:b_off[4] + c4, :]                   # (C4, N)
    score = pl.reciprocal(1.0 + jnp.exp(-f2), approx=True)       # sigmoid (f32)

    # --- per-image score broadcast: VPU broadcasts + adds (no matmul) --------
    score_full = score[:, 0:1] * bcast_ref[0:1, :]
    for n in range(1, n_img):
        score_full = score_full + score[:, n:n + 1] * bcast_ref[n:n + 1, :]

    # --- SE gate + identity residual (downsample=None => Cin == C4) + relu ---
    o_ref[...] = jnp.maximum(h3 * score_full + x, 0.0).astype(o_ref.dtype)


def _prep_operands(params, N, H, W, Cin):
    """Fold BN / pooling scales into weights and pack operands into slabs."""
    (w1, s1, b1, w2, s2, b2, w3, s3, b3, wfc1, bfc1, wfc2, bfc2) = params
    P = w1.shape[1]
    C4 = w3.shape[1]
    Cr = wfc1.shape[1]
    HW = H * W
    NHW = N * HW
    P8 = _align(P, 8)
    Cr8 = _align(Cr, 8)
    bf16 = jnp.bfloat16

    # BN scales folded into conv weights; GAP 1/(H*W) folded into SE fc1.
    w1f = jnp.pad(w1.T * s1[:, None], ((0, P8 - P), (0, 0)))            # (P8, Cin)
    w2f = jnp.transpose(w2, (2, 0, 1)) * s2[:, None, None]              # (P, 9, P)
    w2f = jnp.pad(w2f, ((0, P8 - P), (0, 0), (0, P8 - P))).reshape(P8, 9 * P8)
    w3f = jnp.pad(w3.T * s3[:, None], ((0, 0), (0, P8 - P)))            # (C4, P8)
    wf1 = jnp.pad(wfc1.T / float(HW), ((0, Cr8 - Cr), (0, 0)))          # (Cr8, C4)
    wf2 = jnp.pad(wfc2.T, ((0, 0), (0, Cr8 - Cr)))                      # (C4, Cr8)

    # One bf16 weight slab, 16-sublane-aligned row offsets, left-justified cols.
    weights = [w1f, w2f, w3f, wf1, wf2]
    w_cols = 128
    assert max(w.shape[1] for w in weights) <= w_cols
    w_off, cur = [], 0
    for w in weights:
        w_off.append(cur)
        cur = _align(cur + w.shape[0], 16)
    wslab = jnp.zeros((cur, w_cols), bf16)
    for off, w in zip(w_off, weights):
        wslab = wslab.at[off:off + w.shape[0], :w.shape[1]].set(w.astype(bf16))

    # One f32 bias slab, 8-aligned row offsets.
    biases = [jnp.pad(b1, (0, P8 - P)), jnp.pad(b2, (0, P8 - P)), b3,
              jnp.pad(bfc1, (0, Cr8 - Cr)), bfc2]
    b_off, cur = [], 0
    for b in biases:
        b_off.append(cur)
        cur = _align(cur + b.shape[0], 8)
    bslab = jnp.zeros((cur, 1), jnp.float32)
    for off, b in zip(b_off, biases):
        bslab = bslab.at[off:off + b.shape[0], 0].set(b)

    # Precomputed 3x3 border-validity masks, replicated over P8 sublanes.
    pos = jnp.arange(NHW, dtype=jnp.int32) % HW
    hh, ww = pos // W, pos % W
    masks = []
    for ky in (-1, 0, 1):
        for kx in (-1, 0, 1):
            ok = ((hh + ky >= 0) & (hh + ky < H) &
                  (ww + kx >= 0) & (ww + kx < W)).astype(jnp.float32)
            masks.append(jnp.broadcast_to(ok[None, :], (P8, NHW)))
    mask = jnp.concatenate(masks, axis=0)                                # (9*P8, NHW)

    # Per-image indicator (score broadcast) and its transpose (GAP pooling).
    img_id = jnp.arange(NHW, dtype=jnp.int32) // HW
    bcast = (img_id[None, :] ==
             jnp.arange(N, dtype=jnp.int32)[:, None]).astype(jnp.float32)  # (N, NHW)
    pool = bcast.T.astype(bf16)                                            # (NHW, N)

    static = dict(n_img=N, w_img=W, cin=Cin, p8=P8, c4=C4, cr8=Cr8,
                  w_off=tuple(w_off), b_off=tuple(b_off))
    return (wslab, bslab, mask, pool, bcast), static


def bottleneck_forward_cm(x_cm, operands, static):
    """Channels-major entry: x_cm is (Cin, N*H*W); returns (C4, N*H*W)."""
    wslab, bslab, mask, pool, bcast = operands
    C4, NHW = static["c4"], x_cm.shape[1]

    full = lambda shape: pl.BlockSpec(shape, lambda i: (0, 0))
    grid_spec = pltpu.PrefetchScalarGridSpec(
        num_scalar_prefetch=0,
        grid=(1,),                                   # whole batch in one step
        in_specs=[full(x_cm.shape), full(wslab.shape), full(bslab.shape),
                  full(mask.shape), full(pool.shape), full(bcast.shape)],
        out_specs=full((C4, NHW)),                   # lane-dense output block
    )

    flops = (2 * NHW * (static["p8"] * static["cin"]
                        + static["p8"] * 9 * static["p8"]
                        + C4 * static["p8"] + 2 * C4)
             + 2 * static["n_img"] * (static["cr8"] * C4 + C4 * static["cr8"]))
    bytes_accessed = (sum(int(a.size) * a.dtype.itemsize
                          for a in (x_cm, wslab, bslab, mask, pool, bcast))
                      + C4 * NHW * 4)

    return pl.pallas_call(
        functools.partial(_bottleneck_kernel, **static),
        out_shape=jax.ShapeDtypeStruct((C4, NHW), jnp.float32),
        grid_spec=grid_spec,
        compiler_params=pltpu.CompilerParams(
            dimension_semantics=("arbitrary",)),
        cost_estimate=pl.CostEstimate(
            flops=int(flops),
            transcendentals=int(C4 * static["n_img"]),
            bytes_accessed=int(bytes_accessed)),
    )(x_cm, wslab, bslab, mask, pool, bcast)


@jax.jit
def bottleneck_forward(x_nchw, params):
    """x_nchw: (N, Cin, H, W); params in 'math' layout (see __main__)."""
    N, Cin, H, W = x_nchw.shape
    operands, static = _prep_operands(params, N, H, W, Cin)
    # TODO(synk): for chained blocks keep activations in (C, N*H*W) layout and
    # call bottleneck_forward_cm directly to avoid these relayout passes.
    x_cm = jnp.transpose(x_nchw, (1, 0, 2, 3)).reshape(Cin, N * H * W)
    out_cm = bottleneck_forward_cm(x_cm, operands, static)
    C4 = static["c4"]
    return jnp.transpose(out_cm.reshape(C4, N, H, W), (1, 0, 2, 3))


def reference_nchw(x, params):
    """Pure-JAX reference mirroring the PyTorch forward (NCHW, eval-mode BN)."""
    (w1, s1, b1, w2, s2, b2, w3, s3, b3, wfc1, bfc1, wfc2, bfc2) = params
    Cin = x.shape[1]
    P = w1.shape[1]
    C4 = w3.shape[1]

    def conv(inp, w_oihw, pad):
        return jax.lax.conv_general_dilated(
            inp, w_oihw, window_strides=(1, 1),
            padding=[(pad, pad), (pad, pad)],
            dimension_numbers=("NCHW", "OIHW", "NCHW"),
            precision=jax.lax.Precision.HIGHEST)

    w1_oihw = w1.T.reshape(P, Cin, 1, 1)
    w2_oihw = jnp.transpose(w2.reshape(3, 3, P, P), (3, 2, 0, 1))
    w3_oihw = w3.T.reshape(C4, P, 1, 1)

    def bn(t, s, b):
        return t * s.reshape(1, -1, 1, 1) + b.reshape(1, -1, 1, 1)

    out = jax.nn.relu(bn(conv(x, w1_oihw, 0), s1, b1))
    out = jax.nn.relu(bn(conv(out, w2_oihw, 1), s2, b2))
    out = bn(conv(out, w3_oihw, 0), s3, b3)
    v = jnp.mean(out, axis=(2, 3))                                 # (N, C4)
    score = jax.nn.sigmoid(jax.nn.relu(v @ wfc1 + bfc1) @ wfc2 + bfc2)
    out = out * score[:, :, None, None]
    out = jax.nn.relu(out + x)
    return out


if __name__ == "__main__":
    N, H, W = 2, 8, 8
    inplanes, planes, ratio, expansion = 16, 4, 4, 4
    C4 = planes * expansion
    assert inplanes == C4, "downsample=None requires inplanes == planes*expansion"
    Cr = C4 // ratio

    key = jax.random.PRNGKey(0)
    ks = jax.random.split(key, 11)

    def bn_fold(k, C):
        k1, k2, k3, k4 = jax.random.split(k, 4)
        gamma = 1.0 + 0.1 * jax.random.normal(k1, (C,), jnp.float32)
        beta = 0.1 * jax.random.normal(k2, (C,), jnp.float32)
        mean = 0.1 * jax.random.normal(k3, (C,), jnp.float32)
        var = 1.0 + 0.1 * jnp.abs(jax.random.normal(k4, (C,), jnp.float32))
        scale = gamma * jax.lax.rsqrt(var + 1e-5)
        bias = beta - mean * scale
        return scale, bias

    w1 = 0.1 * jax.random.normal(ks[0], (inplanes, planes), jnp.float32)
    w2 = 0.1 * jax.random.normal(ks[1], (9, planes, planes), jnp.float32)
    w3 = 0.1 * jax.random.normal(ks[2], (planes, C4), jnp.float32)
    s1, b1 = bn_fold(ks[3], planes)
    s2, b2 = bn_fold(ks[4], planes)
    s3, b3 = bn_fold(ks[5], C4)
    wfc1 = 0.1 * jax.random.normal(ks[6], (C4, Cr), jnp.float32)
    bfc1 = 0.1 * jax.random.normal(ks[7], (Cr,), jnp.float32)
    wfc2 = 0.1 * jax.random.normal(ks[8], (Cr, C4), jnp.float32)
    bfc2 = 0.1 * jax.random.normal(ks[9], (C4,), jnp.float32)
    params = (w1, s1, b1, w2, s2, b2, w3, s3, b3, wfc1, bfc1, wfc2, bfc2)

    x_nchw = jax.random.normal(ks[10], (N, inplanes, H, W), jnp.float32)

    out = jax.block_until_ready(bottleneck_forward(x_nchw, params))
    ref = reference_nchw(x_nchw, params)
    if not jnp.allclose(out, ref, atol=1e-2, rtol=1e-2):
        raise AssertionError(
            "mismatch: max abs diff = "
            f"{float(jnp.max(jnp.abs(out - ref)))}")
    print("KERNEL_OK")
</pallas_src>

<mosaic_0001>
module attributes {stable_mosaic.version = 11 : i64} {
  func.func @_bottleneck_kernel(%arg0: i32, %arg1: memref<16x128xf32, #tpu.memory_space<vmem>>, %arg2: memref<80x128xbf16, #tpu.memory_space<vmem>>, %arg3: memref<56x1xf32, #tpu.memory_space<vmem>>, %arg4: memref<72x128xf32, #tpu.memory_space<vmem>>, %arg5: memref<128x2xbf16, #tpu.memory_space<vmem>>, %arg6: memref<2x128xf32, #tpu.memory_space<vmem>>, %arg7: memref<16x128xf32, #tpu.memory_space<vmem>>) attributes {dimension_semantics = [#tpu.dimension_semantics<arbitrary>], iteration_bounds = array<i64: 1>, scalar_prefetch = 0 : i64, scratch_operands = 0 : i64, tpu.core_type = #tpu.core_type<tc>, window_params = [{pipeline_mode = #tpu.pipeline_mode<synchronous>, transform_indices = @transform_0, window_bounds = array<i64: 16, 128>}, {pipeline_mode = #tpu.pipeline_mode<synchronous>, transform_indices = @transform_1, window_bounds = array<i64: 80, 128>}, {pipeline_mode = #tpu.pipeline_mode<synchronous>, transform_indices = @transform_2, window_bounds = array<i64: 56, 1>}, {pipeline_mode = #tpu.pipeline_mode<synchronous>, transform_indices = @transform_3, window_bounds = array<i64: 72, 128>}, {pipeline_mode = #tpu.pipeline_mode<synchronous>, transform_indices = @transform_4, window_bounds = array<i64: 128, 2>}, {pipeline_mode = #tpu.pipeline_mode<synchronous>, transform_indices = @transform_5, window_bounds = array<i64: 2, 128>}, {pipeline_mode = #tpu.pipeline_mode<synchronous>, transform_indices = @transform_6, window_bounds = array<i64: 16, 128>}]} {
    %c0 = arith.constant 0 : index
    %c0_0 = arith.constant 0 : index
    %0 = vector.load %arg1[%c0, %c0_0] : memref<16x128xf32, #tpu.memory_space<vmem>>, vector<16x128xf32>
    %c0_1 = arith.constant 0 : index
    %c0_2 = arith.constant 0 : index
    %1 = vector.load %arg2[%c0_1, %c0_2] : memref<80x128xbf16, #tpu.memory_space<vmem>>, vector<8x16xbf16>
    %2 = arith.truncf %0 : vector<16x128xf32> to vector<16x128xbf16>
    %cst = arith.constant dense<0.000000e+00> : vector<8x128xf32>
    %3 = tpu.matmul %1, %2, %cst {dimension_numbers = #tpu.dot_dimension_numbers<[1], [0], [0], [1], [0, 0, 1, 1], [], []>} : vector<8x16xbf16>, vector<16x128xbf16>, vector<8x128xf32> -> vector<8x128xf32>
    %c0_3 = arith.constant 0 : index
    %c0_4 = arith.constant 0 : index
    %4 = vector.load %arg3[%c0_3, %c0_4] : memref<56x1xf32, #tpu.memory_space<vmem>>, vector<8x1xf32>
    %5 = vector.broadcast %4 : vector<8x1xf32> to vector<8x128xf32>
    %6 = arith.addf %3, %5 : vector<8x128xf32>
    %cst_5 = arith.constant 0.000000e+00 : f32
    %7 = vector.broadcast %cst_5 : f32 to vector<8x128xf32>
    %8 = arith.maximumf %6, %7 : vector<8x128xf32>
    %cst_6 = arith.constant 0.000000e+00 : f32
    %9 = vector.broadcast %cst_6 : f32 to vector<8x9xf32>
    %10 = vector.extract_strided_slice %8 {offsets = [0, 0], sizes = [8, 119], strides = [1, 1]} : vector<8x128xf32> to vector<8x119xf32>
    %11 = tpu.concatenate %9, %10 in 1 : vector<8x9xf32>, vector<8x119xf32> -> vector<8x128xf32>
    %cst_7 = arith.constant 0.000000e+00 : f32
    %12 = vector.broadcast %cst_7 : f32 to vector<8x8xf32>
    %13 = vector.extract_strided_slice %8 {offsets = [0, 0], sizes = [8, 120], strides = [1, 1]} : vector<8x128xf32> to vector<8x120xf32>
    %14 = tpu.concatenate %12, %13 in 1 : vector<8x8xf32>, vector<8x120xf32> -> vector<8x128xf32>
    %cst_8 = arith.constant 0.000000e+00 : f32
    %15 = vector.broadcast %cst_8 : f32 to vector<8x7xf32>
    %16 = vector.extract_strided_slice %8 {offsets = [0, 0], sizes = [8, 121], strides = [1, 1]} : vector<8x128xf32> to vector<8x121xf32>
    %17 = tpu.concatenate %15, %16 in 1 : vector<8x7xf32>, vector<8x121xf32> -> vector<8x128xf32>
    %cst_9 = arith.constant 0.000000e+00 : f32
    %18 = vector.broadcast %cst_9 : f32 to vector<8x1xf32>
    %19 = vector.extract_strided_slice %8 {offsets = [0, 0], sizes = [8, 127], strides = [1, 1]} : vector<8x128xf32> to vector<8x127xf32>
    %20 = tpu.concatenate %18, %19 in 1 : vector<8x1xf32>, vector<8x127xf32> -> vector<8x128xf32>
    %cst_10 = arith.constant 0.000000e+00 : f32
    %21 = vector.broadcast %cst_10 : f32 to vector<8x1xf32>
    %22 = vector.extract_strided_slice %8 {offsets = [0, 1], sizes = [8, 127], strides = [1, 1]} : vector<8x128xf32> to vector<8x127xf32>
    %23 = tpu.concatenate %22, %21 in 1 : vector<8x127xf32>, vector<8x1xf32> -> vector<8x128xf32>
    %cst_11 = arith.constant 0.000000e+00 : f32
    %24 = vector.broadcast %cst_11 : f32 to vector<8x7xf32>
    %25 = vector.extract_strided_slice %8 {offsets = [0, 7], sizes = [8, 121], strides = [1, 1]} : vector<8x128xf32> to vector<8x121xf32>
    %26 = tpu.concatenate %25, %24 in 1 : vector<8x121xf32>, vector<8x7xf32> -> vector<8x128xf32>
    %cst_12 = arith.constant 0.000000e+00 : f32
    %27 = vector.broadcast %cst_12 : f32 to vector<8x8xf32>
    %28 = vector.extract_strided_slice %8 {offsets = [0, 8], sizes = [8, 120], strides = [1, 1]} : vector<8x128xf32> to vector<8x120xf32>
    %29 = tpu.concatenate %28, %27 in 1 : vector<8x120xf32>, vector<8x8xf32> -> vector<8x128xf32>
    %cst_13 = arith.constant 0.000000e+00 : f32
    %30 = vector.broadcast %cst_13 : f32 to vector<8x9xf32>
    %31 = vector.extract_strided_slice %8 {offsets = [0, 9], sizes = [8, 119], strides = [1, 1]} : vector<8x128xf32> to vector<8x119xf32>
    %32 = tpu.concatenate %31, %30 in 1 : vector<8x119xf32>, vector<8x9xf32> -> vector<8x128xf32>
    %33 = tpu.concatenate %11, %14, %17, %20, %8, %23, %26, %29, %32 in 0 : vector<8x128xf32>, vector<8x128xf32>, vector<8x128xf32>, vector<8x128xf32>, vector<8x128xf32>, vector<8x128xf32>, vector<8x128xf32>, vector<8x128xf32>, vector<8x128xf32> -> vector<72x128xf32>
    %c0_14 = arith.constant 0 : index
    %c0_15 = arith.constant 0 : index
    %34 = vector.load %arg4[%c0_14, %c0_15] : memref<72x128xf32, #tpu.memory_space<vmem>>, vector<72x128xf32>
    %35 = arith.mulf %33, %34 : vector<72x128xf32>
    %c16 = arith.constant 16 : index
    %c0_16 = arith.constant 0 : index
    %36 = vector.load %arg2[%c16, %c0_16] : memref<80x128xbf16, #tpu.memory_space<vmem>>, vector<8x72xbf16>
    %37 = arith.truncf %35 : vector<72x128xf32> to vector<72x128xbf16>
    %cst_17 = arith.constant dense<0.000000e+00> : vector<8x128xf32>
    %38 = tpu.matmul %36, %37, %cst_17 {dimension_numbers = #tpu.dot_dimension_numbers<[1], [0], [0], [1], [0, 0, 1, 1], [], []>} : vector<8x72xbf16>, vector<72x128xbf16>, vector<8x128xf32> -> vector<8x128xf32>
    %c8 = arith.constant 8 : index
    %c0_18 = arith.constant 0 : index
    %39 = vector.load %arg3[%c8, %c0_18] : memref<56x1xf32, #tpu.memory_space<vmem>>, vector<8x1xf32>
    %40 = vector.broadcast %39 : vector<8x1xf32> to vector<8x128xf32>
    %41 = arith.addf %38, %40 : vector<8x128xf32>
    %cst_19 = arith.constant 0.000000e+00 : f32
    %42 = vector.broadcast %cst_19 : f32 to vector<8x128xf32>
    %43 = arith.maximumf %41, %42 : vector<8x128xf32>
    %c32 = arith.constant 32 : index
    %c0_20 = arith.constant 0 : index
    %44 = vector.load %arg2[%c32, %c0_20] : memref<80x128xbf16, #tpu.memory_space<vmem>>, vector<16x8xbf16>
    %45 = arith.truncf %43 : vector<8x128xf32> to vector<8x128xbf16>
    %cst_21 = arith.constant dense<0.000000e+00> : vector<16x128xf32>
    %46 = tpu.matmul %44, %45, %cst_21 {dimension_numbers = #tpu.dot_dimension_numbers<[1], [0], [0], [1], [0, 0, 1, 1], [], []>} : vector<16x8xbf16>, vector<8x128xbf16>, vector<16x128xf32> -> vector<16x128xf32>
    %c16_22 = arith.constant 16 : index
    %c0_23 = arith.constant 0 : index
    %47 = vector.load %arg3[%c16_22, %c0_23] : memref<56x1xf32, #tpu.memory_space<vmem>>, vector<16x1xf32>
    %48 = vector.broadcast %47 : vector<16x1xf32> to vector<16x128xf32>
    %49 = arith.addf %46, %48 : vector<16x128xf32>
    %50 = arith.truncf %49 : vector<16x128xf32> to vector<16x128xbf16>
    %c0_24 = arith.constant 0 : index
    %c0_25 = arith.constant 0 : index
    %51 = vector.load %arg5[%c0_24, %c0_25] : memref<128x2xbf16, #tpu.memory_space<vmem>>, vector<128x2xbf16>
    %cst_26 = arith.constant dense<0.000000e+00> : vector<16x2xf32>
    %52 = tpu.matmul %50, %51, %cst_26 {dimension_numbers = #tpu.dot_dimension_numbers<[1], [0], [0], [1], [0, 0, 1, 1], [], []>} : vector<16x128xbf16>, vector<128x2xbf16>, vector<16x2xf32> -> vector<16x2xf32>
    %c48 = arith.constant 48 : index
    %c0_27 = arith.constant 0 : index
    %53 = vector.load %arg2[%c48, %c0_27] : memref<80x128xbf16, #tpu.memory_space<vmem>>, vector<8x16xbf16>
    %54 = arith.truncf %52 : vector<16x2xf32> to vector<16x2xbf16>
    %cst_28 = arith.constant dense<0.000000e+00> : vector<8x2xf32>
    %55 = tpu.matmul %53, %54, %cst_28 {dimension_numbers = #tpu.dot_dimension_numbers<[1], [0], [0], [1], [0, 0, 1, 1], [], []>} : vector<8x16xbf16>, vector<16x2xbf16>, vector<8x2xf32> -> vector<8x2xf32>
    %c32_29 = arith.constant 32 : index
    %c0_30 = arith.constant 0 : index
    %56 = vector.load %arg3[%c32_29, %c0_30] : memref<56x1xf32, #tpu.memory_space<vmem>>, vector<8x1xf32>
    %57 = vector.broadcast %56 : vector<8x1xf32> to vector<8x2xf32>
    %58 = arith.addf %55, %57 : vector<8x2xf32>
    %cst_31 = arith.constant 0.000000e+00 : f32
    %59 = vector.broadcast %cst_31 : f32 to vector<8x2xf32>
    %60 = arith.maximumf %58, %59 : vector<8x2xf32>
    %c64 = arith.constant 64 : index
    %c0_32 = arith.constant 0 : index
    %61 = vector.load %arg2[%c64, %c0_32] : memref<80x128xbf16, #tpu.memory_space<vmem>>, vector<16x8xbf16>
    %62 = arith.truncf %60 : vector<8x2xf32> to vector<8x2xbf16>
    %cst_33 = arith.constant dense<0.000000e+00> : vector<16x2xf32>
    %63 = tpu.matmul %61, %62, %cst_33 {dimension_numbers = #tpu.dot_dimension_numbers<[1], [0], [0], [1], [0, 0, 1, 1], [], []>} : vector<16x8xbf16>, vector<8x2xbf16>, vector<16x2xf32> -> vector<16x2xf32>
    %c40 = arith.constant 40 : index
    %c0_34 = arith.constant 0 : index
    %64 = vector.load %arg3[%c40, %c0_34] : memref<56x1xf32, #tpu.memory_space<vmem>>, vector<16x1xf32>
    %65 = vector.broadcast %64 : vector<16x1xf32> to vector<16x2xf32>
    %66 = arith.addf %63, %65 : vector<16x2xf32>
    %cst_35 = arith.constant 0.000000e+00 : f32
    %67 = vector.broadcast %cst_35 : f32 to vector<16x2xf32>
    %68 = arith.subf %67, %66 : vector<16x2xf32>
    %69 = math.exp %68 : vector<16x2xf32>
    %cst_36 = arith.constant 1.000000e+00 : f32
    %70 = vector.broadcast %cst_36 : f32 to vector<16x2xf32>
    %71 = arith.addf %70, %69 : vector<16x2xf32>
    %72 = tpu.reciprocal %71 {approx = true} : vector<16x2xf32> -> vector<16x2xf32>
    %73 = vector.extract_strided_slice %72 {offsets = [0, 0], sizes = [16, 1], strides = [1, 1]} : vector<16x2xf32> to vector<16x1xf32>
    %c0_37 = arith.constant 0 : index
    %c0_38 = arith.constant 0 : index
    %74 = vector.load %arg6[%c0_37, %c0_38] : memref<2x128xf32, #tpu.memory_space<vmem>>, vector<1x128xf32>
    %75 = vector.broadcast %73 : vector<16x1xf32> to vector<16x128xf32>
    %76 = vector.broadcast %74 : vector<1x128xf32> to vector<16x128xf32>
    %77 = arith.mulf %75, %76 : vector<16x128xf32>
    %78 = vector.extract_strided_slice %72 {offsets = [0, 1], sizes = [16, 1], strides = [1, 1]} : vector<16x2xf32> to vector<16x1xf32>
    %c1 = arith.constant 1 : index
    %c0_39 = arith.constant 0 : index
    %79 = vector.load %arg6[%c1, %c0_39] : memref<2x128xf32, #tpu.memory_space<vmem>>, vector<1x128xf32>
    %80 = vector.broadcast %78 : vector<16x1xf32> to vector<16x128xf32>
    %81 = vector.broadcast %79 : vector<1x128xf32> to vector<16x128xf32>
    %82 = arith.mulf %80, %81 : vector<16x128xf32>
    %83 = arith.addf %77, %82 : vector<16x128xf32>
    %84 = arith.mulf %49, %83 : vector<16x128xf32>
    %85 = arith.addf %84, %0 : vector<16x128xf32>
    %cst_40 = arith.constant 0.000000e+00 : f32
    %86 = vector.broadcast %cst_40 : f32 to vector<16x128xf32>
    %87 = arith.maximumf %85, %86 : vector<16x128xf32>
    %c0_41 = arith.constant 0 : index
    %c0_42 = arith.constant 0 : index
    %88 = vector.load %arg7[%c0_41, %c0_42] : memref<16x128xf32, #tpu.memory_space<vmem>>, vector<16x128xf32>
    tpu.vector_store %arg7[%c0_41, %c0_42], %87 {strides = array<i32>} : memref<16x128xf32, #tpu.memory_space<vmem>>, vector<16x128xf32>,
    return
  }
  func.func @transform_0(%arg0: i32) -> (i32, i32) {
    %c0_i32 = arith.constant 0 : i32
    %c0_i32_0 = arith.constant 0 : i32
    %c0_i32_1 = arith.constant 0 : i32
    return %c0_i32, %c0_i32_0 : i32, i32
  }
  func.func @transform_1(%arg0: i32) -> (i32, i32) {
    %c0_i32 = arith.constant 0 : i32
    %c0_i32_0 = arith.constant 0 : i32
    %c0_i32_1 = arith.constant 0 : i32
    return %c0_i32, %c0_i32_0 : i32, i32
  }
  func.func @transform_2(%arg0: i32) -> (i32, i32) {
    %c0_i32 = arith.constant 0 : i32
    %c0_i32_0 = arith.constant 0 : i32
    %c0_i32_1 = arith.constant 0 : i32
    return %c0_i32, %c0_i32_0 : i32, i32
  }
  func.func @transform_3(%arg0: i32) -> (i32, i32) {
    %c0_i32 = arith.constant 0 : i32
    %c0_i32_0 = arith.constant 0 : i32
    %c0_i32_1 = arith.constant 0 : i32
    return %c0_i32, %c0_i32_0 : i32, i32
  }
  func.func @transform_4(%arg0: i32) -> (i32, i32) {
    %c0_i32 = arith.constant 0 : i32
    %c0_i32_0 = arith.constant 0 : i32
    %c0_i32_1 = arith.constant 0 : i32
    return %c0_i32, %c0_i32_0 : i32, i32
  }
  func.func @transform_5(%arg0: i32) -> (i32, i32) {
    %c0_i32 = arith.constant 0 : i32
    %c0_i32_0 = arith.constant 0 : i32
    %c0_i32_1 = arith.constant 0 : i32
    return %c0_i32, %c0_i32_0 : i32, i32
  }
  func.func @transform_6(%arg0: i32) -> (i32, i32) {
    %c0_i32 = arith.constant 0 : i32
    %c0_i32_0 = arith.constant 0 : i32
    %c0_i32_1 = arith.constant 0 : i32
    return %c0_i32, %c0_i32_0 : i32, i32
  }
}

</mosaic_0001>

<bundles_post_ra>
// kernel: bottleneck_forward.1
= control target key start
LH: loop header
LB: loop body
LE: loop exit
PB: predicated region body
PF: predicated region fallthrough
CT: control target
= control target key end

     0   :  { %v679_v0 = vmov 0.0   ;;  %vm680_vm0 = vmmov 0   ;;  %v681_v4 = vmov 0   ;;  %vm34_vm1 = vcmask 130048   ;;  %s682_s28 = smov 121   ;;  %s683_s29 = smov 119   ;;  %s895_s0 = inlined_call_operand.vmem [shape: f32[16,128], index: 0, kind: input, shape index: {}]   ;;  %s896_s2 = inlined_call_operand.vmem [shape: f32[56,1], index: 2, kind: input, shape index: {}]   ;;  %s897_s1 = inlined_call_operand.vmem [shape: bf16[80,128], index: 1, kind: input, shape index: {}]   ;;  %s898_s3 = inlined_call_operand.vmem [shape: f32[72,128], index: 3, kind: input, shape index: {}]   ;;  %s899_s4 = inlined_call_operand.vmem [shape: bf16[128,2], index: 4, kind: input, shape index: {}]   ;;  %s900_s5 = inlined_call_operand.vmem [shape: f32[2,128], index: 5, kind: input, shape index: {}]   ;;  %s901_s6 = inlined_call_operand.vmem [shape: f32[16,128], index: 6, kind: output, shape index: {}]  }
   0x1   :  { %587 = vmatprep.subr.bf16.mxu1 %v679_v0  ;;  %v730_v1 = vld [vmem:[%s895_s0] sm:$0xff]  ;;  %v735_v2 = vld [vmem:[%s895_s0 + $0x8] sm:$0xff]  ;;  %589 = vmatprep.mubr.msk.bf16.mxu1 %vm680_vm0, %v679_v0  ;;  %s684_s30 = smov 120   ;;  %s685_s7 = smov 127   ;;  %v202_v14 = vld [vmem:[%s896_s2 + $0x10] sm:$0xff]  ;;  %vm118_vm2 = vcmask 973824  }
   0x2   :  { %v27_v3 = vpack.c.bf16 %v735_v2, %v730_v1  ;;  %657 = vset.pattern.permute.xlu0 %v681_v4  ;;  %v28_v5 = vld [vmem:[%s896_s2] sm:$0xff]  ;;  %658 = vset.pattern.permute.xlu1 %v681_v4  ;;  %s686_s8 = smov 7   ;;  %s687_s9 = smov 1   ;;  %v144_v16 = vld [vmem:[%s896_s2 + $0x8] sm:$0xff]  ;;  %v428_v17 = vld [vmem:[%s896_s2 + $0x30] sm:$0xff]  ;;  %vm108_vm3 = vcmask 990208  }
   0x3   :  { %31 = vperm.xlu0 %657, %v28_v5   ;;  %607 = vmatprep.subr.bf16.mxu0 %v679_v0  ;;  %v26_v6 = vld [vmem:[%s897_s1] sm:$0xf]  ;;  %s688_s10 = smov 9   ;;  %s689_s11 = smov 8   ;;  %v203_v18 = vld [vmem:[%s896_s2 + $0x18] sm:$0xff]  ;;  %v427_v19 = vld [vmem:[%s896_s2 + $0x28] sm:$0xff] }
   0x4   :  { %588 = vmatpush3.bf16.msra.mxu1 %v27_v3  ;;  %609 = vmatprep.mubr.msk.bf16.mxu0 %vm680_vm0, %v679_v0  ;;  %v374_v15 = vld [vmem:[%s896_s2 + $0x20] sm:$0xff]  ;;  %vm113_vm4 = vcmask 982016   ;;  %v126_v25 = vld [vmem:[%s898_s3 + $0x30] sm:$0xff]  ;;  %v127_v27 = vld [vmem:[%s898_s3 + $0x38] sm:$0xff]  ;;  %vm103_vm5 = vcmask 1039360   ;;  %vm154_vm6 = vcmask 1043456  }
   0x5   :  { %593 = vmatprep.subr.bf16.mxu1 %v679_v0  ;;  %v128_v20 = vld [vmem:[%s898_s3 + $0x40] sm:$0xff]  ;;  %v125_v34 = vld [vmem:[%s898_s3 + $0x28] sm:$0xff]  ;;  %vm93_vm7 = vcmask 56320   ;;  %vm98_vm8 = vcmask 7168   ;;  %v122_v42 = vld [vmem:[%s898_s3 + $0x10] sm:$0xff]  ;;  %vm83_vm9 = vcmask 72704  }
   0x6   :  { %v124_v38 = vld [vmem:[%s898_s3 + $0x20] sm:$0xff]  ;;  %v123_v44 = vld [vmem:[%s898_s3 + $0x18] sm:$0xff]  ;;  %vm88_vm10 = vcmask 64512   ;;  %v121_v54 = vld [vmem:[%s898_s3 + $0x8] sm:$0xff]  ;;  %vm150_vm11 = vcmask 588800  }
   0x7   :  { %590 = vmatmul.mubr.msk.bf16.vlgmr.msra.gmra.mxu1 %vm34_vm1, %v26_v6  ;;  %v120_v52 = vld [vmem:[%s898_s3] sm:$0xff]  ;;  %v138_v60 = vld [vmem:[%s897_s1 + $0x8] sm:$0xf] }
   0x8   :  { %603 = vmatprep.mubr.msk.bf16.mxu1 %vm680_vm0, %v679_v0 }
  0x7e   :  { %v32_v7 = vpop.permute.xlu0 %31 }
  0xc7   :  { %v72_v8 = vpop.f32.mrf.mxu1 }
  0xc8   :  { %v73_v9 = vadd.f32 %v72_v8, %v32_v7 }
  0xc9   :  { %v591_v10 = vpop.f32.mrf.mxu1 }
  0xca   :  { %v754_v11 = vmax.f32 %v73_v9, 0.0  ;;  %v661_v9 = vld [vmem:[%s897_s1 + $0x10] sm:$0xff]   ;;  %v662_v10 = vld [vmem:[%s899_s4 + $0x38] sm:$0xff]  }
  0xcb   :  { %v75_v12 = vpop.f32.mrf.mxu1 }
  0xcc   :  { %105 = vrot.lane.b32.xlu1 %v754_v11, %s682_s28  ;;  %115 = vrot.lane.b32.xlu0 %v754_v11, %s683_s29  ;;  %v133_v46 = vmul.f32 %v124_v38, %v754_v11  ;;  %v664_v12 = vld [vmem:[%s899_s4 + $0x28] sm:$0xff]  }
  0xcd   :  { %v592_v13 = vpop.f32.mrf.mxu1 }
  0xce   :  { %v665_v13 = vld [vmem:[%s899_s4 + $0x20] sm:$0xff]  }
  0xd0   :  { %110 = vrot.lane.b32.xlu1 %v754_v11, %s684_s30  ;;  %100 = vrot.lane.b32.xlu0 %v754_v11, %s685_s7 }
  0xd4   :  { %90 = vrot.lane.b32.xlu1 %v754_v11, %s686_s8  ;;  %95 = vrot.lane.b32.xlu0 %v754_v11, %s687_s9 }
  0xd8   :  { %80 = vrot.lane.b32.xlu1 %v754_v11, %s688_s10  ;;  %85 = vrot.lane.b32.xlu0 %v754_v11, %s689_s11  ;;  %v663_v11 = vld [vmem:[%s899_s4 + $0x30] sm:$0xff]  }
  0xdc   :  { %206 = vperm.xlu0 %657, %v202_v14   ;;  %147 = vperm.xlu1 %658, %v144_v16   ;;  %v666_v14 = vld [vmem:[%s899_s4 + $0x18] sm:$0xff]   ;;  %v668_v16 = vld [vmem:[%s899_s4 + $0x8] sm:$0xff]  }
  0xe0   :  { %377 = vperm.xlu0 %657, %v374_v15   ;;  %211 = vperm.xlu1 %658, %v203_v18   ;;  %v667_v15 = vld [vmem:[%s899_s4 + $0x10] sm:$0xff]  }
  0xe4   :  { %436 = vperm.xlu0 %657, %v428_v17   ;;  %431 = vperm.xlu1 %658, %v427_v19   ;;  %v669_v17 = vld [vmem:[%s899_s4] sm:$0xff]  }
 0x13e   :  { %v106_v21 = vpop.permute.xlu1 %105  ;;  %v116_v22 = vpop.permute.xlu0 %115 }
 0x13f   :  { %v119_v23 = vsel %vm118_vm2, %v116_v22, 0.0  ;;  %v109_v26 = vsel %vm108_vm3, %v106_v21, 0.0 }
 0x140   :  { %v137_v24 = vmul.f32 %v128_v20, %v119_v23  ;;  %v135_v32 = vmul.f32 %v126_v25, %v109_v26 }
 0x142   :  { %v143_v28 = vpack.c.bf16 %v137_v24, %v137_v24  ;;  %v111_v29 = vpop.permute.xlu1 %110  ;;  %v101_v30 = vpop.permute.xlu0 %100 }
 0x143   :  { %v114_v31 = vsel %vm113_vm4, %v111_v29, 0.0  ;;  %v104_v35 = vsel %vm103_vm5, %v101_v30, 0.0 }
 0x144   :  { %v136_v33 = vmul.f32 %v127_v27, %v114_v31  ;;  %v156_v36 = vsel %vm154_vm6, %v143_v28, 0  ;;  %v134_v41 = vmul.f32 %v125_v34, %v104_v35 }
 0x145   :  { %594 = vmatpush3.bf16.msra.mxu1 %v156_v36 }
 0x146   :  { %v142_v37 = vpack.c.bf16 %v136_v33, %v135_v32  ;;  %v91_v39 = vpop.permute.xlu1 %90  ;;  %v96_v40 = vpop.permute.xlu0 %95  ;;  %595 = vmatprep.subr.bf16.mxu1 %v679_v0  ;;  %v141_v49 = vpack.c.bf16 %v134_v41, %v133_v46  ;;  %v372_v32 = vld [vmem:[%s897_s1 + $0x18] sm:$0xf] }
 0x147   :  { %v94_v43 = vsel %vm93_vm7, 0.0, %v91_v39  ;;  %v99_v45 = vsel %vm98_vm8, 0.0, %v96_v40 }
 0x148   :  { %v131_v50 = vmul.f32 %v122_v42, %v94_v43  ;;  %v132_v51 = vmul.f32 %v123_v44, %v99_v45  ;;  %v670_v42 = vld [vmem:[%s897_s1 + $0x20] sm:$0xff]  }
 0x149   :  { %596 = vmatpush3.bf16.msra.mxu1 %v142_v37 }
 0x14a   :  { %v81_v47 = vpop.permute.xlu1 %80  ;;  %v86_v48 = vpop.permute.xlu0 %85  ;;  %597 = vmatprep.subr.bf16.mxu1 %v679_v0  ;;  %v140_v56 = vpack.c.bf16 %v132_v51, %v131_v50 }
 0x14b   :  { %v84_v53 = vsel %vm83_vm9, 0.0, %v81_v47  ;;  %v89_v55 = vsel %vm88_vm10, 0.0, %v86_v48 }
 0x14c   :  { %v129_v57 = vmul.f32 %v120_v52, %v84_v53  ;;  %v130_v58 = vmul.f32 %v121_v54, %v89_v55 }
 0x14d   :  { %598 = vmatpush3.bf16.msra.mxu1 %v141_v49 }
 0x14e   :  { %599 = vmatprep.subr.bf16.mxu1 %v679_v0  ;;  %v139_v59 = vpack.c.bf16 %v130_v58, %v129_v57 }
 0x151   :  { %600 = vmatpush3.bf16.msra.mxu1 %v140_v56 }
 0x152   :  { %601 = vmatprep.subr.bf16.mxu1 %v679_v0 }
 0x155   :  { %602 = vmatpush3.bf16.msra.mxu1 %v139_v59 }
 0x156   :  { %633 = vmatprep.subr.bf16.mxu1 %v679_v0 }
 0x157   :  { %v148_v61 = vpop.permute.xlu1 %147  ;;  %v207_v20 = vpop.permute.xlu0 %206 }
 0x158   :  { %604 = vmatmul.mubr.msk.bf16.vlgmr.msra.gmra.mxu1 %vm150_vm11, %v138_v60  ;;  %v690_v60 = vmov 1  }
 0x159   :  { %635 = vmatprep.mubr.msk.bf16.mxu1 %vm680_vm0, %v679_v0 }
 0x15b   :  { %v212_v21 = vpop.permute.xlu1 %211  ;;  %v378_v33 = vpop.permute.xlu0 %377 }
 0x15f   :  { %v432_v43 = vpop.permute.xlu1 %431  ;;  %v437_v47 = vpop.permute.xlu0 %436 }
 0x218   :  { %v192_v62 = vpop.f32.mrf.mxu1 }
 0x219   :  { %v193_v63 = vadd.f32 %v192_v62, %v148_v61  ;;  %v562_v62 = vld [vmem:[%s900_s5] ss:$0 sm:$0xff] }
 0x21a   :  { %v605_v3 = vpop.f32.mrf.mxu1 }
 0x21b   :  { %v198_v4 = vmax.f32 %v193_v63, 0.0  ;;  %v563_v63 = vld [vmem:[%s900_s5 + $0x1] ss:$0 sm:$0xff] }
 0x21c   :  { %v195_v5 = vpop.f32.mrf.mxu1 }
 0x21d   :  { %v201_v6 = vpack.c.bf16 %v198_v4, %v198_v4 }
 0x21e   :  { %v606_v7 = vpop.f32.mrf.mxu1 }
 0x21f   :  { %v223_v8 = vsel %vm154_vm6, %v201_v6, 0 }
 0x220   :  { %608 = vmatpush3.bf16.msra.mxu0 %v223_v8 }
 0x221   :  { %613 = vmatprep.subr.bf16.mxu0 %v679_v0 }
 0x223   :  { %610 = vmatmul.mubr.msk.bf16.vlgmr.msra.gmra.mxu0 %vm88_vm10, %v661_v9 }
 0x224   :  { %614 = vmatpush3.bf16.msra.mxu0 %v662_v10  ;;  %629 = vmatprep.mubr.msk.bf16.mxu0 %vm680_vm0, %v679_v0 }
 0x225   :  { %615 = vmatprep.subr.bf16.mxu0 %v679_v0 }
 0x228   :  { %616 = vmatpush3.bf16.msra.mxu0 %v663_v11 }
 0x229   :  { %617 = vmatprep.subr.bf16.mxu0 %v679_v0 }
 0x22c   :  { %618 = vmatpush3.bf16.msra.mxu0 %v664_v12 }
 0x22d   :  { %619 = vmatprep.subr.bf16.mxu0 %v679_v0 }
 0x230   :  { %620 = vmatpush3.bf16.msra.mxu0 %v665_v13 }
 0x231   :  { %621 = vmatprep.subr.bf16.mxu0 %v679_v0 }
 0x234   :  { %622 = vmatpush3.bf16.msra.mxu0 %v666_v14 }
 0x235   :  { %623 = vmatprep.subr.bf16.mxu0 %v679_v0 }
 0x238   :  { %624 = vmatpush3.bf16.msra.mxu0 %v667_v15 }
 0x239   :  { %625 = vmatprep.subr.bf16.mxu0 %v679_v0 }
 0x23c   :  { %626 = vmatpush3.bf16.msra.mxu0 %v668_v16 }
 0x23d   :  { %627 = vmatprep.subr.bf16.mxu0 %v679_v0 }
 0x240   :  { %628 = vmatpush3.bf16.msra.mxu0 %v669_v17 }
 0x2e3   :  { %v259_v18 = vpop.f32.mrf.mxu0 }
 0x2e4   :  { %v861_v23 = vadd.f32 %v259_v18, %v207_v20 }
 0x2e5   :  { %v611_v19 = vpop.f32.mrf.mxu0 }
 0x2e7   :  { %v262_v22 = vpop.f32.mrf.mxu0 }
 0x2e8   :  { %v863_v24 = vadd.f32 %v262_v22, %v212_v21 }
 0x2e9   :  { %v612_v25 = vpop.f32.mrf.mxu0 }
 0x2ea   :  { %v266_v26 = vpack.c.bf16 %v863_v24, %v861_v23 }
 0x2ec   :  { %630 = vmatmul.mubr.bf16.vlgmr.msra.gmra.mxu0 %v266_v26 }
 0x3ac   :  { %v365_v27 = vpop.f32.mrf.mxu0 }
 0x3ae   :  { %v631_v28 = vpop.f32.mrf.mxu0 }
 0x3b0   :  { %v368_v29 = vpop.f32.mrf.mxu0 }
 0x3b1   :  { %v373_v30 = vpack.c.bf16 %v368_v29, %v365_v27 }
 0x3b2   :  { %v632_v31 = vpop.f32.mrf.mxu0 }
 0x3b3   :  { %634 = vmatpush3.bf16.msra.mxu1 %v373_v30 }
 0x3b4   :  { %639 = vmatprep.subr.bf16.mxu1 %v679_v0 }
 0x3b6   :  { %636 = vmatmul.mubr.msk.bf16.vlgmr.msra.gmra.mxu1 %vm34_vm1, %v372_v32 }
 0x3b7   :  { %641 = vmatprep.mubr.msk.bf16.mxu1 %vm680_vm0, %v679_v0 }
 0x476   :  { %v417_v34 = vpop.f32.mrf.mxu1 }
 0x477   :  { %v418_v35 = vadd.f32 %v417_v34, %v378_v33 }
 0x478   :  { %v637_v36 = vpop.f32.mrf.mxu1 }
 0x479   :  { %v423_v37 = vmax.f32 %v418_v35, 0.0 }
 0x47a   :  { %v420_v38 = vpop.f32.mrf.mxu1 }
 0x47b   :  { %v426_v39 = vpack.c.bf16 %v423_v37, %v423_v37 }
 0x47c   :  { %v638_v40 = vpop.f32.mrf.mxu1 }
 0x47d   :  { %v448_v41 = vsel %vm154_vm6, %v426_v39, 0 }
 0x47e   :  { %640 = vmatpush3.bf16.msra.mxu1 %v448_v41 }
 0x481   :  { %642 = vmatmul.mubr.msk.bf16.vlgmr.msra.gmra.mxu1 %vm88_vm10, %v670_v42 }
 0x541   :  { %v484_v44 = vpop.f32.mrf.mxu1 }
 0x542   :  { %v485_v0 = vadd.f32 %v484_v44, %v432_v43 }
 0x543   :  { %v643_v45 = vpop.f32.mrf.mxu1 }
 0x544   :  { %v491_v46 = vsub.f32 0.0, %v485_v0 }
 0x545   :  { %v487_v48 = vpop.f32.mrf.mxu1 }
 0x546   :  { %v493_v49 = vmul.f32 1.442695, %v491_v46  ;;  %v488_v50 = vadd.f32 %v487_v48, %v437_v47 }
 0x547   :  { %v644_v51 = vpop.f32.mrf.mxu1 }
 0x548   :  { %671 = vpow2.f32 %v493_v49  ;;  %v492_v52 = vsub.f32 0.0, %v488_v50 }
 0x54a   :  { %v495_v53 = vmul.f32 1.442695, %v492_v52 }
 0x54c   :  { %673 = vpow2.f32 %v495_v53 }
 0x555   :  { %v672_v54 = vpop.eup %671 }
 0x556   :  { %v497_v55 = vadd.f32 1.0, %v672_v54 }
 0x558   :  { %675 = vrcp.f32 %v497_v55 }
 0x559   :  { %v674_v56 = vpop.eup %673 }
 0x55a   :  { %v498_v57 = vadd.f32 1.0, %v674_v56 }
 0x55c   :  { %677 = vrcp.f32 %v498_v57 }
 0x565   :  { %v676_v58 = vpop.eup %675 }
 0x566   :  { %504 = vperm.xlu1 %658, %v676_v58  }
 0x569   :  { %v678_v59 = vpop.eup %677 }
 0x56a   :  { %659 = vset.pattern.permute.xlu1 %v690_v60  ;;  %509 = vperm.xlu0 %657, %v678_v59  }
 0x56b   :  { %520 = vperm.xlu1 %659, %v676_v58  }
 0x56e   :  { %660 = vset.pattern.permute.xlu0 %v690_v60 }
 0x56f   :  { %524 = vperm.xlu0 %660, %v678_v59  }
 0x5e1   :  { %v505_v61 = vpop.permute.xlu1 %504 }
 0x5e2   :  { %v516_v5 = vmul.f32 %v562_v62, %v505_v61 }
 0x5e5   :  { %v510_v3 = vpop.permute.xlu0 %509 }
 0x5e6   :  { %v521_v4 = vpop.permute.xlu1 %520  ;;  %v517_v9 = vmul.f32 %v562_v62, %v510_v3 }
 0x5e7   :  { %v531_v6 = vmul.f32 %v563_v63, %v521_v4 }
 0x5e9   :  { %v533_v7 = vadd.f32 %v531_v6, %v516_v5 }
 0x5ea   :  { %v525_v8 = vpop.permute.xlu0 %524 }
 0x5eb   :  { %v535_v10 = vmul.f32 %v533_v7, %v861_v23  ;;  %v532_v11 = vmul.f32 %v563_v63, %v525_v8 }
 0x5ed   :  { %v537_v12 = vadd.f32 %v535_v10, %v730_v1  ;;  %v534_v13 = vadd.f32 %v532_v11, %v517_v9 }
 0x5ef   :  { %v539_v14 = vmax.f32 %v537_v12, 0.0  ;;  %v536_v15 = vmul.f32 %v534_v13, %v863_v24 }
 0x5f1   :  { %541 = vst [vmem:[%s901_s6] sm:$0xff] %v539_v14  ;;  %v538_v16 = vadd.f32 %v536_v15, %v735_v2 }
 0x5f3   :  { %v540_v17 = vmax.f32 %v538_v16, 0.0 }
 0x5f5   :  { %542 = vst [vmem:[%s901_s6 + $0x8] sm:$0xff] %v540_v17 }

</bundles_post_ra>
